<compile_context>
chip_gen: v7x
topology: tpu7x:2x2x1
jax: 0.10.0
libtpu: 0.0.40
codegen_flags: <defaults>
</compile_context>

<pallas_src>
import jax
import jax.numpy as jnp
from jax.experimental import pallas as pl
from jax.experimental.pallas import tpu as pltpu


def _round_up(n, m):
    return ((n + m - 1) // m) * m


def _scorer_kernel(x_ref, y_ref, w1_ref, b1_ref, w2_ref, b2_ref, o_ref):
    F = x_ref.shape[1]
    # h = tanh( cat([x, y]) @ W1 + b1 ) == tanh( x @ W1[:F] + y @ W1[F:] + b1 )
    # Static slices of the VMEM-resident W1 ref (zero-cost views, MXU matmuls).
    h = jnp.dot(x_ref[...], w1_ref[:F, :], preferred_element_type=jnp.float32)
    h = h + jnp.dot(y_ref[...], w1_ref[F:, :], preferred_element_type=jnp.float32)
    h = jnp.tanh(h + b1_ref[...])                                     # [TB, H]
    # Second layer (output width 1): VPU multiply + lane reduction.
    s = jnp.sum(h * w2_ref[...], axis=-1, keepdims=True) + b2_ref[0, 0]
    o_ref[...] = jax.nn.sigmoid(s)                                    # [TB, 1]


def _choose_batch_tile(B, F, H, block_b, vmem_budget_bytes=12 * 1024 * 1024):
    """Pick a batch tile (multiple of 8 sublanes) that keeps resident weights +
    double-buffered x/y tiles + (lane-padded) output tiles within budget."""
    w1_bytes = 2 * F * H * 4
    misc_bytes = 2 * 8 * max(H, 128) * 4          # b1 row + w2 row (padded)
    avail = max(vmem_budget_bytes - w1_bytes - misc_bytes, 0)
    # Per batch-row cost: x + y (double-buffered) + output tile lane-padded to
    # 128 lanes (double-buffered).
    per_row = 2 * 2 * F * 4 + 2 * 128 * 4
    tb_budget = (max(avail // per_row, 8) // 8) * 8
    tb = min(_round_up(block_b, 8), _round_up(B, 8), tb_budget)
    return max(tb, 8)


def scorer_forward(x, y, w1, b1, w2, b2, *, block_b=1024):
    """x, y: [B, F]; w1: [2F, H]; b1: [H]; w2: [H, 1]; b2: [1] -> scores [B]."""
    B, F = x.shape
    H = w1.shape[1]

    tb = _choose_batch_tile(B, F, H, block_b)
    Bp = _round_up(B, tb)
    if Bp != B:
        pad = Bp - B
        x = jnp.pad(x, ((0, pad), (0, 0)))
        y = jnp.pad(y, ((0, pad), (0, 0)))

    b1_2d = b1.reshape(1, H)
    w2_row = w2.reshape(1, H)   # [H, 1] -> [1, H] row for the lane-wise reduce
    b2_2d = b2.reshape(1, 1)

    out = pl.pallas_call(
        _scorer_kernel,
        out_shape=jax.ShapeDtypeStruct((Bp, 1), jnp.float32),
        grid_spec=pltpu.PrefetchScalarGridSpec(
            num_scalar_prefetch=0,
            grid=(Bp // tb,),
            in_specs=[
                pl.BlockSpec((tb, F), lambda i: (i, 0)),        # x batch tile
                pl.BlockSpec((tb, F), lambda i: (i, 0)),        # y batch tile
                pl.BlockSpec((2 * F, H), lambda i: (0, 0)),     # W1 (VMEM-resident)
                pl.BlockSpec((1, H), lambda i: (0, 0)),         # b1 (resident)
                pl.BlockSpec((1, H), lambda i: (0, 0)),         # w2 row (resident)
                pl.BlockSpec((1, 1), lambda i: (0, 0),
                             memory_space=pltpu.MemorySpace.SMEM),  # b2 scalar
            ],
            out_specs=pl.BlockSpec((tb, 1), lambda i: (i, 0)),
        ),
        compiler_params=pltpu.CompilerParams(
            dimension_semantics=("parallel",)),
    )(x, y, w1, b1_2d, w2_row, b2_2d)

    # torch .squeeze(): [B, 1] -> [B]
    return out[:B, 0]


def _reference(x, y, w1, b1, w2, b2):
    xy = jnp.concatenate([x, y], axis=1)
    h = jnp.tanh(xy @ w1 + b1)
    s = h @ w2 + b2
    return jax.nn.sigmoid(s).squeeze(-1)


if __name__ == "__main__":
    # Small shapes consistent with the module: input_size = 2F = 256,
    # hidden = input_size // 2 = 128, batch = 8.
    B, F = 8, 128
    input_size = 2 * F
    hidden = input_size // 2

    key = jax.random.PRNGKey(0)
    kx, ky, kw1, kb1, kw2, kb2, kx2, ky2 = jax.random.split(key, 8)

    x = jax.random.normal(kx, (B, F), dtype=jnp.float32)
    y = jax.random.normal(ky, (B, F), dtype=jnp.float32)

    # Deterministic parameter init (PyTorch-Linear-style uniform bounds).
    bound1 = 1.0 / float(jnp.sqrt(input_size))
    w1 = jax.random.uniform(kw1, (input_size, hidden), jnp.float32, -bound1, bound1)
    b1 = jax.random.uniform(kb1, (hidden,), jnp.float32, -bound1, bound1)
    bound2 = 1.0 / float(jnp.sqrt(hidden))
    w2 = jax.random.uniform(kw2, (hidden, 1), jnp.float32, -bound2, bound2)
    b2 = jax.random.uniform(kb2, (1,), jnp.float32, -bound2, bound2)

    out = jax.block_until_ready(scorer_forward(x, y, w1, b1, w2, b2))
    ref = _reference(x, y, w1, b1, w2, b2)
    assert out.shape == (B,)
    assert jnp.allclose(out, ref, atol=1e-5, rtol=1e-5), "mismatch vs reference (B=8)"

    # Exercise the batch grid + padding path (grid > 1, B not a tile multiple).
    B2 = 300
    x2 = jax.random.normal(kx2, (B2, F), dtype=jnp.float32)
    y2 = jax.random.normal(ky2, (B2, F), dtype=jnp.float32)
    out2 = jax.block_until_ready(
        scorer_forward(x2, y2, w1, b1, w2, b2, block_b=128))
    ref2 = _reference(x2, y2, w1, b1, w2, b2)
    assert out2.shape == (B2,)
    assert jnp.allclose(out2, ref2, atol=1e-5, rtol=1e-5), "mismatch vs reference (B=300)"

    print("KERNEL_OK")
</pallas_src>

<mosaic_0001>
module attributes {stable_mosaic.version = 11 : i64} {
  func.func @_scorer_kernel(%arg0: i32, %arg1: memref<8x128xf32, #tpu.memory_space<vmem>>, %arg2: memref<8x128xf32, #tpu.memory_space<vmem>>, %arg3: memref<256x128xf32, #tpu.memory_space<vmem>>, %arg4: memref<1x128xf32, #tpu.memory_space<vmem>>, %arg5: memref<1x128xf32, #tpu.memory_space<vmem>>, %arg6: memref<1x1xf32, #tpu.memory_space<smem>>, %arg7: memref<8x1xf32, #tpu.memory_space<vmem>>) attributes {dimension_semantics = [#tpu.dimension_semantics<parallel>], iteration_bounds = array<i64: 1>, scalar_prefetch = 0 : i64, scratch_operands = 0 : i64, tpu.core_type = #tpu.core_type<tc>, window_params = [{transform_indices = @transform_0, window_bounds = array<i64: 8, 128>}, {transform_indices = @transform_1, window_bounds = array<i64: 8, 128>}, {pipeline_mode = #tpu.pipeline_mode<synchronous>, transform_indices = @transform_2, window_bounds = array<i64: 256, 128>}, {pipeline_mode = #tpu.pipeline_mode<synchronous>, transform_indices = @transform_3, window_bounds = array<i64: 1, 128>}, {pipeline_mode = #tpu.pipeline_mode<synchronous>, transform_indices = @transform_4, window_bounds = array<i64: 1, 128>}, {transform_indices = @transform_5, window_bounds = array<i64: 1, 1>}, {transform_indices = @transform_6, window_bounds = array<i64: 8, 1>}]} {
    %c0 = arith.constant 0 : index
    %c0_0 = arith.constant 0 : index
    %0 = vector.load %arg1[%c0, %c0_0] : memref<8x128xf32, #tpu.memory_space<vmem>>, vector<8x128xf32>
    %c0_1 = arith.constant 0 : index
    %c0_2 = arith.constant 0 : index
    %1 = vector.load %arg3[%c0_1, %c0_2] : memref<256x128xf32, #tpu.memory_space<vmem>>, vector<128x128xf32>
    %cst = arith.constant dense<0.000000e+00> : vector<8x128xf32>
    %2 = tpu.matmul %0, %1, %cst {dimension_numbers = #tpu.dot_dimension_numbers<[1], [0], [0], [1], [0, 0, 1, 1], [], []>} : vector<8x128xf32>, vector<128x128xf32>, vector<8x128xf32> -> vector<8x128xf32>
    %c0_3 = arith.constant 0 : index
    %c0_4 = arith.constant 0 : index
    %3 = vector.load %arg2[%c0_3, %c0_4] : memref<8x128xf32, #tpu.memory_space<vmem>>, vector<8x128xf32>
    %c128 = arith.constant 128 : index
    %c0_5 = arith.constant 0 : index
    %4 = vector.load %arg3[%c128, %c0_5] : memref<256x128xf32, #tpu.memory_space<vmem>>, vector<128x128xf32>
    %cst_6 = arith.constant dense<0.000000e+00> : vector<8x128xf32>
    %5 = tpu.matmul %3, %4, %cst_6 {dimension_numbers = #tpu.dot_dimension_numbers<[1], [0], [0], [1], [0, 0, 1, 1], [], []>} : vector<8x128xf32>, vector<128x128xf32>, vector<8x128xf32> -> vector<8x128xf32>
    %6 = arith.addf %2, %5 : vector<8x128xf32>
    %c0_7 = arith.constant 0 : index
    %c0_8 = arith.constant 0 : index
    %7 = vector.load %arg4[%c0_7, %c0_8] : memref<1x128xf32, #tpu.memory_space<vmem>>, vector<1x128xf32>
    %8 = vector.broadcast %7 : vector<1x128xf32> to vector<8x128xf32>
    %9 = arith.addf %6, %8 : vector<8x128xf32>
    %10 = math.tanh %9 : vector<8x128xf32>
    %c0_9 = arith.constant 0 : index
    %c0_10 = arith.constant 0 : index
    %11 = vector.load %arg5[%c0_9, %c0_10] : memref<1x128xf32, #tpu.memory_space<vmem>>, vector<1x128xf32>
    %12 = vector.broadcast %11 : vector<1x128xf32> to vector<8x128xf32>
    %13 = arith.mulf %10, %12 : vector<8x128xf32>
    %cst_11 = arith.constant dense<0.000000e+00> : vector<8xf32>
    %14 = vector.multi_reduction <add>, %13, %cst_11 [1] : vector<8x128xf32> to vector<8xf32>
    %15 = vector.shape_cast %14 : vector<8xf32> to vector<8x1xf32>
    %c0_12 = arith.constant 0 : index
    %c0_13 = arith.constant 0 : index
    %16 = memref.load %arg6[%c0_12, %c0_13] : memref<1x1xf32, #tpu.memory_space<smem>>
    %17 = vector.broadcast %16 : f32 to vector<8x1xf32>
    %18 = arith.addf %15, %17 : vector<8x1xf32>
    %19 = arith.negf %18 : vector<8x1xf32>
    %20 = math.exp %19 : vector<8x1xf32>
    %cst_14 = arith.constant 1.000000e+00 : f32
    %21 = vector.broadcast %cst_14 : f32 to vector<8x1xf32>
    %22 = arith.addf %21, %20 : vector<8x1xf32>
    %23 = arith.divf %21, %22 : vector<8x1xf32>
    %c0_15 = arith.constant 0 : index
    %c0_16 = arith.constant 0 : index
    %24 = vector.load %arg7[%c0_15, %c0_16] : memref<8x1xf32, #tpu.memory_space<vmem>>, vector<8x1xf32>
    tpu.vector_store %arg7[%c0_15, %c0_16], %23 {strides = array<i32>} : memref<8x1xf32, #tpu.memory_space<vmem>>, vector<8x1xf32>,
    return
  }
  func.func @transform_0(%arg0: i32) -> (i32, i32) {
    %c0_i32 = arith.constant 0 : i32
    %c0_i32_0 = arith.constant 0 : i32
    return %arg0, %c0_i32 : i32, i32
  }
  func.func @transform_1(%arg0: i32) -> (i32, i32) {
    %c0_i32 = arith.constant 0 : i32
    %c0_i32_0 = arith.constant 0 : i32
    return %arg0, %c0_i32 : i32, i32
  }
  func.func @transform_2(%arg0: i32) -> (i32, i32) {
    %c0_i32 = arith.constant 0 : i32
    %c0_i32_0 = arith.constant 0 : i32
    %c0_i32_1 = arith.constant 0 : i32
    return %c0_i32, %c0_i32_0 : i32, i32
  }
  func.func @transform_3(%arg0: i32) -> (i32, i32) {
    %c0_i32 = arith.constant 0 : i32
    %c0_i32_0 = arith.constant 0 : i32
    %c0_i32_1 = arith.constant 0 : i32
    return %c0_i32, %c0_i32_0 : i32, i32
  }
  func.func @transform_4(%arg0: i32) -> (i32, i32) {
    %c0_i32 = arith.constant 0 : i32
    %c0_i32_0 = arith.constant 0 : i32
    %c0_i32_1 = arith.constant 0 : i32
    return %c0_i32, %c0_i32_0 : i32, i32
  }
  func.func @transform_5(%arg0: i32) -> (i32, i32) {
    %c0_i32 = arith.constant 0 : i32
    %c0_i32_0 = arith.constant 0 : i32
    %c0_i32_1 = arith.constant 0 : i32
    return %c0_i32, %c0_i32_0 : i32, i32
  }
  func.func @transform_6(%arg0: i32) -> (i32, i32) {
    %c0_i32 = arith.constant 0 : i32
    %c0_i32_0 = arith.constant 0 : i32
    return %arg0, %c0_i32 : i32, i32
  }
}

</mosaic_0001>

<bundles_post_ra>
// kernel: tpu_custom_call.1
= control target key start
LH: loop header
LB: loop body
LE: loop exit
PB: predicated region body
PF: predicated region fallthrough
CT: control target
= control target key end

     0   :  { %12 = vsyncpa [#allocation4], 0  ;;  %s617_s0 = inlined_call_operand.hbm [shape: f32[8,128], index: 0, kind: input, shape index: {}]   ;;  %s618_s1 = inlined_call_operand.hbm [shape: f32[8,128], index: 1, kind: input, shape index: {}]   ;;  %s619_s2 = inlined_call_operand.hbm [shape: f32[256,128], index: 2, kind: input, shape index: {}]   ;;  %s620_s3 = inlined_call_operand.vmem [shape: f32[1,128], index: 3, kind: input, shape index: {}]   ;;  %s621_s4 = inlined_call_operand.vmem [shape: f32[1,128], index: 4, kind: input, shape index: {}]   ;;  %s622_s5 = inlined_call_operand.<no memory space> [shape: f32[1,1], index: 5, kind: input, shape index: {}]   ;;  %s623_s6 = inlined_call_operand.vmem [shape: f32[8,1], index: 6, kind: output, shape index: {}]  }
   0x1   :  { %13 = vsyncpa [#allocation6], 0  ;;  %s510_s21 = smov [#allocation5]   ;;  %s511_s23 = smov [#allocation3]  }
   0x2   :  { %s30_s22 = sshll.u32 %s510_s21, 4  ;;  %s20_s24 = sshll.u32 %s511_s23, 4  ;;  %s31_s22 = int_to_ptr.vmem [resolvable:$true] %s30_s22  ;;  %s21_s24 = int_to_ptr.vmem [resolvable:$true] %s20_s24 }
   0x3   :  { %s440_s27 = scalar_lea.hbm %s618_s1, 128 }
   0x4   :  { %p441_p0 = scmp.ne.s32.totalorder %s618_s1, %s440_s27  ;;  %p444_p1 = scmp.lt.u32.totalorder %s440_s27, %s618_s1 }
   0x6   :  { %p446_p2 = pnand %p444_p1, %p441_p0 }
   0x8   :  { %449 = shalt.err (!%p446_p2)
}
   0x9   :  { %s450_s8 = scalar_lea.vmem %s31_s22, 128  ;;  %p455_p4 = scmp.lt.s32.totalorder %s31_s22, %s31_s22 }
   0xa   :  { %p451_p3 = scmp.ne.s32.totalorder %s31_s22, %s450_s8  ;;  %p456_p5 = scmp.lt.s32.totalorder %s450_s8, %s450_s8 }
   0xc   :  { %p457_p6 = por %p456_p5, %p455_p4 }
   0xe   :  { %p458_p7 = pnand %p457_p6, %p451_p3 }
  0x10   :  { %461 = shalt.err (!%p458_p7)
}
  0x11   :  { %33 = dma.hbm_to_vmem [thread:$0]  %s618_s1, 128, %s31_s22, [#allocation6]  }
  0x12   :  { %s462_s13 = scalar_lea.hbm %s617_s0, 128 }
  0x13   :  { %p463_p8 = scmp.ne.s32.totalorder %s617_s0, %s462_s13  ;;  %p466_p9 = scmp.lt.u32.totalorder %s462_s13, %s617_s0 }
  0x15   :  { %p468_p10 = pnand %p466_p9, %p463_p8 }
  0x17   :  { %471 = shalt.err (!%p468_p10)
}
  0x18   :  { %s472_s18 = scalar_lea.vmem %s21_s24, 128  ;;  %p477_p12 = scmp.lt.s32.totalorder %s21_s24, %s21_s24 }
  0x19   :  { %p473_p11 = scmp.ne.s32.totalorder %s21_s24, %s472_s18  ;;  %p478_p13 = scmp.lt.s32.totalorder %s472_s18, %s472_s18 }
  0x1b   :  { %p479_p0 = por %p478_p13, %p477_p12 }
  0x1d   :  { %p480_p1 = pnand %p479_p0, %p473_p11 }
  0x1f   :  { %483 = shalt.err (!%p480_p1)
}
  0x20   :  { %23 = dma.hbm_to_vmem [thread:$0]  %s617_s0, 128, %s21_s24, [#allocation4]  }
  0x21   :  { %s512_s20 = smov [#allocation7]   ;;  %s484_s25 = scalar_lea.hbm %s619_s2, 4096 }
  0x22   :  { %s39_s21 = sshll.u32 %s512_s20, 4  ;;  %p485_p2 = scmp.ne.s32.totalorder %s619_s2, %s484_s25  ;;  %s40_s21 = int_to_ptr.vmem [resolvable:$true] %s39_s21 }
  0x23   :  { %p488_p3 = scmp.lt.u32.totalorder %s484_s25, %s619_s2 }
  0x25   :  { %p490_p4 = pnand %p488_p3, %p485_p2 }
  0x27   :  { %493 = shalt.err (!%p490_p4)
}
  0x28   :  { %s494_s30 = scalar_lea.vmem %s40_s21, 4096  ;;  %p499_p6 = scmp.lt.s32.totalorder %s40_s21, %s40_s21 }
  0x29   :  { %p495_p5 = scmp.ne.s32.totalorder %s40_s21, %s494_s30  ;;  %p500_p7 = scmp.lt.s32.totalorder %s494_s30, %s494_s30 }
  0x2b   :  { %p501_p8 = por %p500_p7, %p499_p6 }
  0x2d   :  { %p502_p9 = pnand %p501_p8, %p495_p5 }
  0x2f   :  { %505 = shalt.err (!%p502_p9)
}
  0x30   :  { %s513_s0 = smov 128   ;;  %s514_s24 = smov 8  }
  0x31   :  { %45 = dma.hbm_to_vmem [thread:$0]  %s619_s2, 4096, %s40_s21, [#allocation6], %s513_s0, %s513_s0, %s514_s24  }
  0x32   :  { %506 = dma.done.wait [#allocation4], 128  }
  0x33   :  { %507 = vsyncadd [#allocation4], 4294967168 }
  0x34   :  { %508 = dma.done.wait [#allocation6], 4224  }
  0x35   :  { %509 = vsyncadd [#allocation6], 4294963072  ;;  %v515_v0 = vmov 0.0|0.0   ;;  %vm516_vm0 = vmmov 0   ;;  %v517_v1 = vmov 0.0   ;;  %v79_v2 = vld [vmem:[#allocation7 + $0x80] sm:$0xff]  ;;  %v255_v62 = vstv %s622_s5 }
  0x36   :  { %378 = vmatprep.subr.bf16.mxu0 %v515_v0  ;;  %402 = vmatprep.subr.bf16.mxu1 %v515_v0  ;;  %v80_v3 = vld [vmem:[#allocation7 + $0x88] sm:$0xff]  ;;  %v62_v4 = vld [vmem:[#allocation7] sm:$0xff]  ;;  %v81_v7 = vld [vmem:[#allocation7 + $0x90] sm:$0xff]  ;;  %vm263_vm1 = vcmask 7168  }
  0x37   :  { %340 = vmatprep.mubr.msk.f32.mxu0 %vm516_vm0, %v517_v1  ;;  %375 = vmatprep.mubr.msk.f32.mxu1 %vm516_vm0, %v517_v1  ;;  %v379_v5 = vpack.c.bf16 %v80_v3, %v79_v2  ;;  %v63_v6 = vld [vmem:[#allocation7 + $0x8] sm:$0xff]  ;;  %v82_v8 = vld [vmem:[#allocation7 + $0x98] sm:$0xff]  ;;  %v64_v10 = vld [vmem:[#allocation7 + $0x10] sm:$0xff] }
  0x38   :  { %v403_v9 = vpack.c.bf16 %v63_v6, %v62_v4  ;;  %v65_v11 = vld [vmem:[#allocation7 + $0x18] sm:$0xff]  ;;  %v382_v12 = vpack.c.bf16 %v82_v8, %v81_v7  ;;  %v83_v14 = vld [vmem:[#allocation7 + $0xa0] sm:$0xff]  ;;  %v84_v15 = vld [vmem:[#allocation7 + $0xa8] sm:$0xff] }
  0x39   :  { %380 = vmatpush3.bf16.msra.mxu0 %v379_v5  ;;  %v406_v13 = vpack.c.bf16 %v65_v11, %v64_v10  ;;  %v66_v16 = vld [vmem:[#allocation7 + $0x20] sm:$0xff]  ;;  %v67_v17 = vld [vmem:[#allocation7 + $0x28] sm:$0xff]  ;;  %v385_v18 = vpack.c.bf16 %v84_v15, %v83_v14  ;;  %v85_v20 = vld [vmem:[#allocation7 + $0xb0] sm:$0xff] }
  0x3a   :  { %404 = vmatpush3.bf16.msra.mxu1 %v403_v9  ;;  %381 = vmatprep.subr.bf16.mxu0 %v515_v0  ;;  %v409_v19 = vpack.c.bf16 %v67_v17, %v66_v16  ;;  %v86_v21 = vld [vmem:[#allocation7 + $0xb8] sm:$0xff]  ;;  %v68_v22 = vld [vmem:[#allocation7 + $0x30] sm:$0xff]  ;;  %v87_v26 = vld [vmem:[#allocation7 + $0xc0] sm:$0xff] }
  0x3b   :  { %405 = vmatprep.subr.bf16.mxu1 %v515_v0  ;;  %v69_v23 = vld [vmem:[#allocation7 + $0x38] sm:$0xff]  ;;  %v388_v24 = vpack.c.bf16 %v86_v21, %v85_v20  ;;  %v88_v27 = vld [vmem:[#allocation7 + $0xc8] sm:$0xff]  ;;  %v70_v28 = vld [vmem:[#allocation7 + $0x40] sm:$0xff] }
  0x3c   :  { %v412_v25 = vpack.c.bf16 %v69_v23, %v68_v22  ;;  %v71_v29 = vld [vmem:[#allocation7 + $0x48] sm:$0xff]  ;;  %v391_v30 = vpack.c.bf16 %v88_v27, %v87_v26  ;;  %v89_v32 = vld [vmem:[#allocation7 + $0xd0] sm:$0xff]  ;;  %v90_v33 = vld [vmem:[#allocation7 + $0xd8] sm:$0xff] }
  0x3d   :  { %383 = vmatpush3.bf16.msra.mxu0 %v382_v12  ;;  %v415_v31 = vpack.c.bf16 %v71_v29, %v70_v28  ;;  %v72_v34 = vld [vmem:[#allocation7 + $0x50] sm:$0xff]  ;;  %v73_v35 = vld [vmem:[#allocation7 + $0x58] sm:$0xff]  ;;  %v394_v36 = vpack.c.bf16 %v90_v33, %v89_v32  ;;  %v91_v38 = vld [vmem:[#allocation7 + $0xe0] sm:$0xff] }
  0x3e   :  { %407 = vmatpush3.bf16.msra.mxu1 %v406_v13  ;;  %384 = vmatprep.subr.bf16.mxu0 %v515_v0  ;;  %v418_v37 = vpack.c.bf16 %v73_v35, %v72_v34  ;;  %v92_v39 = vld [vmem:[#allocation7 + $0xe8] sm:$0xff]  ;;  %v74_v40 = vld [vmem:[#allocation7 + $0x60] sm:$0xff]  ;;  %v93_v44 = vld [vmem:[#allocation7 + $0xf0] sm:$0xff] }
  0x3f   :  { %408 = vmatprep.subr.bf16.mxu1 %v515_v0  ;;  %v75_v41 = vld [vmem:[#allocation7 + $0x68] sm:$0xff]  ;;  %v397_v42 = vpack.c.bf16 %v92_v39, %v91_v38  ;;  %v94_v45 = vld [vmem:[#allocation7 + $0xf8] sm:$0xff]  ;;  %v76_v46 = vld [vmem:[#allocation7 + $0x70] sm:$0xff] }
  0x40   :  { %v421_v43 = vpack.c.bf16 %v75_v41, %v74_v40  ;;  %v77_v47 = vld [vmem:[#allocation7 + $0x78] sm:$0xff]  ;;  %v400_v48 = vpack.c.bf16 %v94_v45, %v93_v44  ;;  %v61_v51 = vld [vmem:[#allocation3] sm:$0xff] }
  0x41   :  { %386 = vmatpush3.bf16.msra.mxu0 %v385_v18  ;;  %v424_v49 = vpack.c.bf16 %v77_v47, %v76_v46  ;;  %v78_v50 = vld [vmem:[#allocation5] sm:$0xff]  ;;  %v271_v54 = vld [vmem:[%s620_s3] ss:$0 sm:$0xff] }
  0x42   :  { %410 = vmatpush3.bf16.msra.mxu1 %v409_v19  ;;  %387 = vmatprep.subr.bf16.mxu0 %v515_v0  ;;  %v272_v59 = vld [vmem:[%s621_s4] ss:$0 sm:$0xff] }
  0x43   :  { %411 = vmatprep.subr.bf16.mxu1 %v515_v0 }
  0x45   :  { %389 = vmatpush3.bf16.msra.mxu0 %v388_v24 }
  0x46   :  { %413 = vmatpush3.bf16.msra.mxu1 %v412_v25  ;;  %390 = vmatprep.subr.bf16.mxu0 %v515_v0 }
  0x47   :  { %414 = vmatprep.subr.bf16.mxu1 %v515_v0 }
  0x49   :  { %392 = vmatpush3.bf16.msra.mxu0 %v391_v30 }
  0x4a   :  { %416 = vmatpush3.bf16.msra.mxu1 %v415_v31  ;;  %393 = vmatprep.subr.bf16.mxu0 %v515_v0 }
  0x4b   :  { %417 = vmatprep.subr.bf16.mxu1 %v515_v0 }
  0x4d   :  { %395 = vmatpush3.bf16.msra.mxu0 %v394_v36 }
  0x4e   :  { %419 = vmatpush3.bf16.msra.mxu1 %v418_v37  ;;  %396 = vmatprep.subr.bf16.mxu0 %v515_v0 }
  0x4f   :  { %420 = vmatprep.subr.bf16.mxu1 %v515_v0 }
  0x51   :  { %398 = vmatpush3.bf16.msra.mxu0 %v397_v42 }
  0x52   :  { %422 = vmatpush3.bf16.msra.mxu1 %v421_v43  ;;  %399 = vmatprep.subr.bf16.mxu0 %v515_v0 }
  0x53   :  { %423 = vmatprep.subr.bf16.mxu1 %v515_v0 }
  0x55   :  { %401 = vmatpush3.bf16.msra.mxu0 %v400_v48 }
  0x56   :  { %425 = vmatpush3.bf16.msra.mxu1 %v424_v49 }
  0x58   :  { %341 = vmatmul.mubr.f32.vlgmr.msra.gmra.mrb[0].mxu0 %v78_v50 }
  0x59   :  { %376 = vmatmul.mubr.f32.vlgmr.msra.gmra.mrb[0].mxu1 %v61_v51 }
 0x12b   :  { %v161_v52 = vpop.f32.mrb[0].mxu0 }
 0x12c   :  { %v231_v53 = vpop.f32.mrb[0].mxu1  ;;  %v342_v55 = vpop.f32.mrb[1].mxu0 }
 0x12d   :  { %v232_v56 = vadd.f32 %v231_v53, %v161_v52  ;;  %v377_v57 = vpop.f32.mrb[1].mxu1 }
 0x12f   :  { %v242_v58 = vadd.f32 %v271_v54, %v232_v56 }
 0x131   :  { %434 = vtanh.f32 %v242_v58 }
 0x13b   :  { %v435_v60 = vpop.eup %434 }
 0x13c   :  { %v251_v61 = vmul.f32 %v435_v60, %v272_v59 }
 0x13e   :  { %252 = vadd.xlane.f32.xlu0 %v251_v61 }
 0x1cb   :  { %v253_v63 = vpop.xlane.xlu0 %252 }
 0x1cc   :  { %v256_v0 = vadd.f32 %v255_v62, %v253_v63 }
 0x1ce   :  { %v273_v1 = vmul.f32 -1.442695, %v256_v0 }
 0x1d0   :  { %436 = vpow2.f32 %v273_v1 }
 0x1da   :  { %v437_v2 = vpop.eup %436 }
 0x1db   :  { %v260_v3 = vadd.f32 1.0, %v437_v2 }
 0x1dd   :  { %438 = vrcp.f32 %v260_v3 }
 0x1e7   :  { %v439_v4 = vpop.eup %438 }
 0x1e8   :  { %264 = vst.msk [vmem:[%s623_s6] sm:$0xff] %vm263_vm1, %v439_v4 }
 0x1e9   :  { %269 = vsyncpa [#allocation4], 1 }
 0x1ea   :  { %270 = vsyncpa [#allocation6], 1 }

</bundles_post_ra>
